<compile_context>
chip_gen: v7x
topology: tpu7x:2x2x1
jax: 0.10.0
libtpu: 0.0.40
codegen_flags: <defaults>
</compile_context>

<pallas_src>
import functools

import jax
import jax.numpy as jnp
from jax import lax
from jax.experimental import pallas as pl
from jax.experimental.pallas import tpu as pltpu

_LN_EPS = 1e-5     # nn.LayerNorm default
_BN_EPS = 1e-5     # nn.BatchNorm1d default
_NORM_EPS = 1e-12  # guard for the Frobenius-norm rsqrt


def _round_up(x, m):
  return (x + m - 1) // m * m


def _people_gnn_kernel(
    x_ref, a_ref, win_ref, bin_ref, wqkv_ref, bqkv_ref, gw1_ref,
    fcw_ref, fcb_ref, vecs_ref,
    out_ref,
    x1_sc, h0_sc, h0g_sc, agg_sc,
    *, n_real, alpha, graph_weight):
  """Grid: 1-D over column blocks of the normalized adjacency (reduction axis)."""
  H = vecs_ref.shape[1]
  np_r = x_ref.shape[0]        # padded rows (multiple of 16)
  np_c = h0g_sc.shape[0]       # padded contraction length (multiple of k_tile)
  kk = pl.program_id(0)
  bf16 = jnp.bfloat16
  dot = functools.partial(jnp.dot, preferred_element_type=jnp.float32)

  def layer_norm(h, g, b):
    mu = jnp.mean(h, axis=-1, keepdims=True)
    var = jnp.mean(jnp.square(h - mu), axis=-1, keepdims=True)
    return (h - mu) * lax.rsqrt(var + _LN_EPS) * g + b

  # -------- first grid step: all O(N*H) work (trans branch, gnn layer-0 and
  # the pre-applied layer-1 weight) is computed once and parked in VMEM. ----
  @pl.when(kk == 0)
  def _init():
    x_bf = x_ref[...].astype(bf16)

    # Fused input projection: [x @ tw0 | x @ gw0_bnfolded]  (one wide matmul).
    zin = dot(x_bf, win_ref[...].astype(bf16)) + bin_ref[...]
    z = zin[:, :H]
    h0 = jnp.maximum(zin[:, H:], 0.0)          # GraphConv layer-0 (BN folded) + ReLU
    h0_bf = h0.astype(bf16)
    h0_sc[...] = h0_bf

    # Pre-apply GraphConv layer-1 weight: the streamed contraction becomes
    # A_blk @ (h0 @ W1) (same FLOPs); this matmul now hides under A prefetch
    # instead of sitting in the un-overlapped last grid step.
    h0g_sc[0:np_r, :] = dot(h0_bf, gw1_ref[...]).astype(bf16)
    if np_c > np_r:
      # Zero the contraction-padding rows (the matching A columns are 0 too,
      # but scratch is uninitialized and 0 * NaN would poison the accumulator).
      h0g_sc[np_r:np_c, :] = jnp.zeros((np_c - np_r, H), bf16)

    # ---------------- TransConv (num_layers=1, num_heads=1) ----------------
    z = layer_norm(z, vecs_ref[0:1, :], vecs_ref[1:2, :])
    z = jnp.maximum(z, 0.0)                    # ReLU (dropout = identity)
    res0 = z

    # Fused Q/K/V projection: one [H, 3H] bf16 matmul, static lane-aligned slices.
    qkv = dot(z.astype(bf16), wqkv_ref[...]) + bqkv_ref[...]
    q = qkv[:, :H]
    k = qkv[:, H:2 * H]
    v = qkv[:, 2 * H:]

    if n_real != np_r:
      # Mask padded rows so they do not leak into the global attention sums.
      rows = lax.broadcasted_iota(jnp.int32, (np_r, 1), 0)
      valid = (rows < n_real).astype(jnp.float32)
      q = q * valid
      k = k * valid

    # full_attention_conv, single head: global (Frobenius) norm, linear attention.
    qn = q * lax.rsqrt(jnp.sum(q * q) + _NORM_EPS)
    kn = k * lax.rsqrt(jnp.sum(k * k) + _NORM_EPS)
    kvs = lax.dot_general(kn.astype(bf16), v.astype(bf16),
                          (((0,), (0,)), ((), ())),
                          preferred_element_type=jnp.float32)   # kn^T @ v, no transpose
    nf = jnp.float32(n_real)
    num = dot(qn.astype(bf16), kvs.astype(bf16)) + nf * v       # [Np, H]
    ks_sum = jnp.sum(kn, axis=0, keepdims=True)                 # [1, H]
    denom = jnp.sum(qn * ks_sum, axis=-1, keepdims=True) + nf   # [Np, 1]
    attn_out = num / denom                    # exact divide; head-mean is identity

    z = alpha * attn_out + (1.0 - alpha) * res0                 # residual
    z = layer_norm(z, vecs_ref[2:3, :], vecs_ref[3:4, :])
    x1_sc[...] = jnp.maximum(z, 0.0).astype(bf16)

    agg_sc[...] = jnp.zeros_like(agg_sc)

  # -------- every step: stream one bf16 column block of A and accumulate ---
  k_tile = a_ref.shape[1]
  start = pl.multiple_of(kk * k_tile, k_tile)
  agg_sc[...] += dot(a_ref[...], h0g_sc[pl.ds(start, k_tile), :])

  # -------- last step: bias+ReLU, residuals, blend, lane-dense fc ----------
  @pl.when(kk == pl.num_programs(0) - 1)
  def _final():
    h0 = h0_sc[...].astype(jnp.float32)
    h = jnp.maximum(agg_sc[...] + vecs_ref[4:5, :], 0.0)        # + gb1 (BN folded), ReLU
    x2 = h + h0                                                 # GraphConv residual
    fused = graph_weight * x2 + (1.0 - graph_weight) * x1_sc[...].astype(jnp.float32)
    out_ref[...] = dot(fused.astype(bf16), fcw_ref[...]) + fcb_ref[...]


def _vmem_budget_bytes():
  """~70% of per-core VMEM; assumes 64 MiB (v7x floor) when the query fails."""
  cap = 64 * 1024 * 1024
  try:
    cap = int(pltpu.get_tpu_info().vmem_capacity_bytes)
  except Exception:
    pass
  return int(cap * 0.7)


def _vmem_estimate(np_rows, np_cols, k_tile, in_ch, hidden, out_pad, n_buf):
  a_bytes = n_buf * np_rows * k_tile * 2            # bf16 A column blocks
  x_bytes = 2 * np_rows * in_ch * 4                 # f32 x (double buffered)
  o_bytes = 2 * np_rows * out_pad * 4               # f32 output
  scratch = (2 * np_rows * hidden * 2               # x1, h0 (bf16)
             + np_cols * hidden * 2                 # h0 @ W1 (bf16)
             + np_rows * hidden * 4)                # agg accumulator (f32)
  weights = 2 * (in_ch * 2 * hidden * 4 + 2 * hidden * 4
                 + hidden * 3 * hidden * 2 + 3 * hidden * 4
                 + hidden * hidden * 2
                 + hidden * out_pad * 2 + out_pad * 4
                 + 8 * hidden * 4)
  return a_bytes + x_bytes + o_bytes + scratch + weights


def _pick_k_tile(n_real, in_ch, hidden, out_pad, budget):
  """Largest 128-multiple column strip whose working set fits the VMEM budget."""
  np_rows = _round_up(n_real, 16)
  cap_cols = _round_up(n_real, 128)
  for cand in (1024, 512, 256, 128):
    kt = min(cand, cap_cols)
    np_cols = _round_up(n_real, kt)
    num_k = np_cols // kt
    n_buf = 3 if num_k >= 3 else 2
    if _vmem_estimate(np_rows, np_cols, kt, in_ch, hidden, out_pad, n_buf) <= budget:
      return kt
  return min(128, cap_cols)


def people_gnn_forward(x, edge_index, params, *, alpha=0.5, graph_weight=0.8,
                       k_tile=None):
  """x: [N, in_channels] float32, edge_index: [2, E] int32."""
  n_real, in_ch = x.shape
  hidden = params['tw0'].shape[1]
  out_ch = params['fcw'].shape[1]
  out_pad = _round_up(out_ch, 128)               # lane-dense final fc

  budget = _vmem_budget_bytes()
  if k_tile is None:
    k_tile = _pick_k_tile(n_real, in_ch, hidden, out_pad, budget)
  assert k_tile % 128 == 0, "k_tile must be a multiple of 128 (lane width)"

  # Rows padded only to 16 (bf16 sublane pack); only the adjacency contraction
  # (column) axis is padded to the k_tile streaming granularity.
  np_rows = _round_up(n_real, 16)
  np_cols = _round_up(n_real, k_tile)
  num_k = np_cols // k_tile

  x_pad = jnp.zeros((np_rows, in_ch), jnp.float32).at[:n_real, :].set(
      x.astype(jnp.float32))

  # Dense normalized adjacency, matching GraphConvLayer exactly:
  #   d = degree(col, N); value = 1/sqrt(d[col]*d[row]) (nan/inf -> 0)
  #   adj[col, row] = value ; aggregation is adj @ h. Stored bf16 for streaming.
  # TODO(synk): for large graphs replace this O(N^2) dense build with CSR +
  # PrefetchScalarGridSpec neighbor gather (traffic O(E) instead of O(N^2)).
  row, col = edge_index[0], edge_index[1]
  deg = jnp.zeros((n_real,), jnp.float32).at[col].add(1.0)
  val = 1.0 / jnp.sqrt(deg[col] * deg[row])
  val = jnp.where(jnp.isfinite(val), val, 0.0)
  adj = jnp.zeros((np_rows, np_cols), jnp.float32).at[col, row].add(val)
  adj = adj.astype(jnp.bfloat16)

  # Fold eval-mode BatchNorms into the preceding linear layers.
  scale0 = params['bn0g'] * lax.rsqrt(params['bn0v'] + _BN_EPS)
  gw0f = params['gw0'] * scale0
  gb0f = (params['gb0'] - params['bn0m']) * scale0 + params['bn0b']
  scale1 = params['bn1g'] * lax.rsqrt(params['bn1v'] + _BN_EPS)
  gw1f = (params['gw1'] * scale1).astype(jnp.bfloat16)
  gb1f = (params['gb1'] - params['bn1m']) * scale1 + params['bn1b']

  # Fuse the two input projections (shared LHS x) and the Q/K/V projections.
  w_in = jnp.concatenate([params['tw0'], gw0f], axis=1)                 # [C, 2H] f32
  b_in = jnp.concatenate([params['tb0'], gb0f], axis=1)                 # [1, 2H] f32
  wqkv = jnp.concatenate([params['wq'], params['wk'], params['wv']],
                         axis=1).astype(jnp.bfloat16)                   # [H, 3H] bf16
  bqkv = jnp.concatenate([params['bq'], params['bk'], params['bv']], axis=1)

  fcw_pad = jnp.zeros((hidden, out_pad), jnp.float32).at[:, :out_ch].set(
      params['fcw']).astype(jnp.bfloat16)
  fcb_pad = jnp.zeros((1, out_pad), jnp.float32).at[:, :out_ch].set(params['fcb'])

  # Pack the remaining (1, H) vectors into one (8, H) array (fewer tiny DMAs).
  vecs = jnp.zeros((8, hidden), jnp.float32)
  vecs = vecs.at[0].set(params['ln0g'][0]).at[1].set(params['ln0b'][0])
  vecs = vecs.at[2].set(params['ln1g'][0]).at[3].set(params['ln1b'][0])
  vecs = vecs.at[4].set(gb1f[0])

  kernel = functools.partial(_people_gnn_kernel, n_real=n_real,
                             alpha=alpha, graph_weight=graph_weight)

  # 3-deep A pipeline: extra column-block DMAs hide under the heavy kk==0 step.
  if num_k >= 3 and hasattr(pl, "Buffered"):
    a_spec = pl.BlockSpec((np_rows, k_tile), lambda kk: (0, kk),
                          pipeline_mode=pl.Buffered(3))
    n_buf = 3
  else:
    a_spec = pl.BlockSpec((np_rows, k_tile), lambda kk: (0, kk))
    n_buf = 2

  vmem_est = _vmem_estimate(np_rows, np_cols, k_tile, in_ch, hidden, out_pad, n_buf)
  vmem_limit = max(32 * 1024 * 1024, vmem_est + 8 * 1024 * 1024)

  # TODO(synk): v7x dual-TC — add a "parallel" row-tile grid axis and hoist the
  # global attention statistics (||q||_F, ||k||_F, sum(kn)) into a small
  # pre-pass so both TensorCores split the streamed contraction.
  out_padded = pl.pallas_call(
      kernel,
      out_shape=jax.ShapeDtypeStruct((np_rows, out_pad), jnp.float32),
      grid_spec=pltpu.PrefetchScalarGridSpec(
          num_scalar_prefetch=0,
          grid=(num_k,),
          in_specs=[
              pl.BlockSpec((np_rows, in_ch), lambda kk: (0, 0)),        # x (padded, f32)
              a_spec,                                                   # A column block (bf16)
              pl.BlockSpec((in_ch, 2 * hidden), lambda kk: (0, 0)),     # fused input W
              pl.BlockSpec((1, 2 * hidden), lambda kk: (0, 0)),         # fused input b
              pl.BlockSpec((hidden, 3 * hidden), lambda kk: (0, 0)),    # fused QKV W (bf16)
              pl.BlockSpec((1, 3 * hidden), lambda kk: (0, 0)),         # fused QKV b
              pl.BlockSpec((hidden, hidden), lambda kk: (0, 0)),        # gw1 (BN folded, bf16)
              pl.BlockSpec((hidden, out_pad), lambda kk: (0, 0)),       # fc W (padded, bf16)
              pl.BlockSpec((1, out_pad), lambda kk: (0, 0)),            # fc b (padded)
              pl.BlockSpec((8, hidden), lambda kk: (0, 0)),             # packed vectors
          ],
          out_specs=pl.BlockSpec((np_rows, out_pad), lambda kk: (0, 0)),
          scratch_shapes=[
              pltpu.VMEM((np_rows, hidden), jnp.bfloat16),   # x1 (trans branch)
              pltpu.VMEM((np_rows, hidden), jnp.bfloat16),   # h0 (gnn layer-0)
              pltpu.VMEM((np_cols, hidden), jnp.bfloat16),   # h0 @ W1 (stream RHS)
              pltpu.VMEM((np_rows, hidden), jnp.float32),    # agg accumulator
          ]),
      compiler_params=pltpu.CompilerParams(
          dimension_semantics=("arbitrary",),
          vmem_limit_bytes=vmem_limit),
  )(x_pad, adj, w_in, b_in, wqkv, bqkv, gw1f, fcw_pad, fcb_pad, vecs)

  return out_padded[:n_real, :out_ch]


def _reference_forward(x, edge_index, params, *, alpha=0.5, graph_weight=0.8):
  """Pure-JAX f32 reference of the PyTorch forward (eval mode)."""
  n = x.shape[0]

  def ln(h, g, b):
    mu = jnp.mean(h, -1, keepdims=True)
    var = jnp.mean((h - mu) ** 2, -1, keepdims=True)
    return (h - mu) / jnp.sqrt(var + _LN_EPS) * g + b

  def bn(h, g, b, m, v):
    return (h - m) / jnp.sqrt(v + _BN_EPS) * g + b

  # TransConv
  z = x @ params['tw0'] + params['tb0']
  z = jnp.maximum(ln(z, params['ln0g'], params['ln0b']), 0.0)
  res0 = z
  q = z @ params['wq'] + params['bq']
  k = z @ params['wk'] + params['bk']
  v = z @ params['wv'] + params['bv']
  qn = q / jnp.sqrt(jnp.sum(q * q))
  kn = k / jnp.sqrt(jnp.sum(k * k))
  num = qn @ (kn.T @ v) + n * v
  denom = jnp.sum(qn * jnp.sum(kn, 0, keepdims=True), -1, keepdims=True) + n
  z = alpha * (num / denom) + (1 - alpha) * res0
  x1 = jnp.maximum(ln(z, params['ln1g'], params['ln1b']), 0.0)
  # GraphConv
  h0 = x @ params['gw0'] + params['gb0']
  h0 = jnp.maximum(bn(h0, params['bn0g'], params['bn0b'],
                      params['bn0m'], params['bn0v']), 0.0)
  row, col = edge_index[0], edge_index[1]
  deg = jnp.zeros((n,), jnp.float32).at[col].add(1.0)
  val = 1.0 / jnp.sqrt(deg[col] * deg[row])
  val = jnp.where(jnp.isfinite(val), val, 0.0)
  adj = jnp.zeros((n, n), jnp.float32).at[col, row].add(val)
  h = (adj @ h0) @ params['gw1'] + params['gb1']
  h = jnp.maximum(bn(h, params['bn1g'], params['bn1b'],
                     params['bn1m'], params['bn1v']), 0.0)
  x2 = h + h0
  fused = graph_weight * x2 + (1 - graph_weight) * x1
  return fused @ params['fcw'] + params['fcb']


def init_params(key, in_channels, hidden, out_channels):
  """Deterministic synthetic init. Linear weights stored pre-transposed as [in, out]."""
  def lin(k, fan_in, fan_out):
    bound = 1.0 / jnp.sqrt(jnp.float32(fan_in))
    kw, kb = jax.random.split(k)
    w = jax.random.uniform(kw, (fan_in, fan_out), jnp.float32, -bound, bound)
    b = jax.random.uniform(kb, (1, fan_out), jnp.float32, -bound, bound)
    return w, b

  ks = jax.random.split(key, 8)
  p = {}
  # TransConv
  p['tw0'], p['tb0'] = lin(ks[0], in_channels, hidden)
  p['ln0g'] = jnp.ones((1, hidden), jnp.float32)
  p['ln0b'] = jnp.zeros((1, hidden), jnp.float32)
  p['wq'], p['bq'] = lin(ks[1], hidden, hidden)   # num_heads = 1
  p['wk'], p['bk'] = lin(ks[2], hidden, hidden)
  p['wv'], p['bv'] = lin(ks[3], hidden, hidden)
  p['ln1g'] = jnp.ones((1, hidden), jnp.float32)
  p['ln1b'] = jnp.zeros((1, hidden), jnp.float32)
  # GraphConv
  p['gw0'], p['gb0'] = lin(ks[4], in_channels, hidden)
  p['bn0g'] = jnp.ones((1, hidden), jnp.float32)
  p['bn0b'] = jnp.zeros((1, hidden), jnp.float32)
  p['bn0m'] = jnp.zeros((1, hidden), jnp.float32)   # running_mean
  p['bn0v'] = jnp.ones((1, hidden), jnp.float32)    # running_var
  p['gw1'], p['gb1'] = lin(ks[5], hidden, hidden)
  p['bn1g'] = jnp.ones((1, hidden), jnp.float32)
  p['bn1b'] = jnp.zeros((1, hidden), jnp.float32)
  p['bn1m'] = jnp.zeros((1, hidden), jnp.float32)
  p['bn1v'] = jnp.ones((1, hidden), jnp.float32)
  # final fc (aggregate='add' -> hidden -> out)
  p['fcw'], p['fcb'] = lin(ks[6], hidden, out_channels)
  return p


if __name__ == "__main__":
  in_channels, hidden_channels, out_channels = 8, 128, 4  # lane-dense hidden

  key = jax.random.PRNGKey(0)
  kx, ke, kp = jax.random.split(key, 3)
  params = init_params(kp, in_channels, hidden_channels, out_channels)

  # Case 1: small graph, single adjacency column block (num_k = 1).
  N, E = 16, 48
  x = jax.random.normal(kx, (N, in_channels), jnp.float32)
  edge_index = jax.random.randint(ke, (2, E), 0, N, dtype=jnp.int32)
  out = jax.block_until_ready(people_gnn_forward(x, edge_index, params))
  assert out.shape == (N, out_channels), out.shape
  assert bool(jnp.all(jnp.isfinite(out)))
  ref = _reference_forward(x, edge_index, params)
  err = float(jnp.max(jnp.abs(out - ref)))
  scale = float(jnp.max(jnp.abs(ref))) + 1e-6
  assert err < 0.05 * scale + 0.05, ("case1 mismatch", err, scale)

  # Case 2: exercises the multi-block streaming path + 3-deep A pipeline
  # (N padded rows != column padding, num_k = 3).
  N2, E2 = 300, 1800
  k2x, k2e = jax.random.split(ke)
  x2 = jax.random.normal(k2x, (N2, in_channels), jnp.float32)
  edge_index2 = jax.random.randint(k2e, (2, E2), 0, N2, dtype=jnp.int32)
  out2 = jax.block_until_ready(
      people_gnn_forward(x2, edge_index2, params, k_tile=128))
  assert out2.shape == (N2, out_channels), out2.shape
  assert bool(jnp.all(jnp.isfinite(out2)))
  ref2 = _reference_forward(x2, edge_index2, params)
  err2 = float(jnp.max(jnp.abs(out2 - ref2)))
  scale2 = float(jnp.max(jnp.abs(ref2))) + 1e-6
  assert err2 < 0.05 * scale2 + 0.05, ("case2 mismatch", err2, scale2)

  print("KERNEL_OK")
</pallas_src>

<mosaic_0001>
module attributes {stable_mosaic.version = 11 : i64} {
  func.func @_people_gnn_kernel(%arg0: i32, %arg1: memref<16x8xf32, #tpu.memory_space<vmem>>, %arg2: memref<16x128xbf16, #tpu.memory_space<vmem>>, %arg3: memref<8x256xf32, #tpu.memory_space<vmem>>, %arg4: memref<1x256xf32, #tpu.memory_space<vmem>>, %arg5: memref<128x384xbf16, #tpu.memory_space<vmem>>, %arg6: memref<1x384xf32, #tpu.memory_space<vmem>>, %arg7: memref<128x128xbf16, #tpu.memory_space<vmem>>, %arg8: memref<128x128xbf16, #tpu.memory_space<vmem>>, %arg9: memref<1x128xf32, #tpu.memory_space<vmem>>, %arg10: memref<8x128xf32, #tpu.memory_space<vmem>>, %arg11: memref<16x128xf32, #tpu.memory_space<vmem>>, %arg12: memref<16x128xbf16, #tpu.memory_space<vmem>>, %arg13: memref<16x128xbf16, #tpu.memory_space<vmem>>, %arg14: memref<128x128xbf16, #tpu.memory_space<vmem>>, %arg15: memref<16x128xf32, #tpu.memory_space<vmem>>) attributes {dimension_semantics = [#tpu.dimension_semantics<arbitrary>], iteration_bounds = array<i64: 1>, scalar_prefetch = 0 : i64, scratch_operands = 4 : i64, tpu.core_type = #tpu.core_type<tc>, window_params = [{pipeline_mode = #tpu.pipeline_mode<synchronous>, transform_indices = @transform_0, window_bounds = array<i64: 16, 8>}, {transform_indices = @transform_1, window_bounds = array<i64: 16, 128>}, {pipeline_mode = #tpu.pipeline_mode<synchronous>, transform_indices = @transform_2, window_bounds = array<i64: 8, 256>}, {pipeline_mode = #tpu.pipeline_mode<synchronous>, transform_indices = @transform_3, window_bounds = array<i64: 1, 256>}, {pipeline_mode = #tpu.pipeline_mode<synchronous>, transform_indices = @transform_4, window_bounds = array<i64: 128, 384>}, {pipeline_mode = #tpu.pipeline_mode<synchronous>, transform_indices = @transform_5, window_bounds = array<i64: 1, 384>}, {pipeline_mode = #tpu.pipeline_mode<synchronous>, transform_indices = @transform_6, window_bounds = array<i64: 128, 128>}, {pipeline_mode = #tpu.pipeline_mode<synchronous>, transform_indices = @transform_7, window_bounds = array<i64: 128, 128>}, {pipeline_mode = #tpu.pipeline_mode<synchronous>, transform_indices = @transform_8, window_bounds = array<i64: 1, 128>}, {pipeline_mode = #tpu.pipeline_mode<synchronous>, transform_indices = @transform_9, window_bounds = array<i64: 8, 128>}, {pipeline_mode = #tpu.pipeline_mode<synchronous>, transform_indices = @transform_10, window_bounds = array<i64: 16, 128>}]} {
    %c0_i32 = arith.constant 0 : i32
    %0 = arith.cmpi eq, %arg0, %c0_i32 : i32
    %1 = arith.extui %0 : i1 to i32
    %c0_i32_0 = arith.constant 0 : i32
    %2 = arith.cmpi ne, %1, %c0_i32_0 : i32
    scf.if %2 {
      %c0_9 = arith.constant 0 : index
      %c0_10 = arith.constant 0 : index
      %15 = vector.load %arg1[%c0_9, %c0_10] : memref<16x8xf32, #tpu.memory_space<vmem>>, vector<16x8xf32>
      %16 = arith.truncf %15 : vector<16x8xf32> to vector<16x8xbf16>
      %c0_11 = arith.constant 0 : index
      %c0_12 = arith.constant 0 : index
      %17 = vector.load %arg3[%c0_11, %c0_12] : memref<8x256xf32, #tpu.memory_space<vmem>>, vector<8x256xf32>
      %18 = arith.truncf %17 : vector<8x256xf32> to vector<8x256xbf16>
      %cst_13 = arith.constant dense<0.000000e+00> : vector<16x256xf32>
      %19 = tpu.matmul %16, %18, %cst_13 {dimension_numbers = #tpu.dot_dimension_numbers<[1], [0], [0], [1], [0, 0, 1, 1], [], []>} : vector<16x8xbf16>, vector<8x256xbf16>, vector<16x256xf32> -> vector<16x256xf32>
      %c0_14 = arith.constant 0 : index
      %c0_15 = arith.constant 0 : index
      %20 = vector.load %arg4[%c0_14, %c0_15] : memref<1x256xf32, #tpu.memory_space<vmem>>, vector<1x256xf32>
      %21 = vector.broadcast %20 : vector<1x256xf32> to vector<16x256xf32>
      %22 = arith.addf %19, %21 : vector<16x256xf32>
      %23 = vector.extract_strided_slice %22 {offsets = [0, 0], sizes = [16, 128], strides = [1, 1]} : vector<16x256xf32> to vector<16x128xf32>
      %24 = vector.extract_strided_slice %22 {offsets = [0, 128], sizes = [16, 128], strides = [1, 1]} : vector<16x256xf32> to vector<16x128xf32>
      %cst_16 = arith.constant 0.000000e+00 : f32
      %25 = vector.broadcast %cst_16 : f32 to vector<16x128xf32>
      %26 = arith.maximumf %24, %25 : vector<16x128xf32>
      %27 = arith.truncf %26 : vector<16x128xf32> to vector<16x128xbf16>
      %c0_17 = arith.constant 0 : index
      %c0_18 = arith.constant 0 : index
      %28 = vector.load %arg13[%c0_17, %c0_18] : memref<16x128xbf16, #tpu.memory_space<vmem>>, vector<16x128xbf16>
      tpu.vector_store %arg13[%c0_17, %c0_18], %27 {strides = array<i32>} : memref<16x128xbf16, #tpu.memory_space<vmem>>, vector<16x128xbf16>,
      %c0_19 = arith.constant 0 : index
      %c0_20 = arith.constant 0 : index
      %29 = vector.load %arg7[%c0_19, %c0_20] : memref<128x128xbf16, #tpu.memory_space<vmem>>, vector<128x128xbf16>
      %cst_21 = arith.constant dense<0.000000e+00> : vector<16x128xf32>
      %30 = tpu.matmul %27, %29, %cst_21 {dimension_numbers = #tpu.dot_dimension_numbers<[1], [0], [0], [1], [0, 0, 1, 1], [], []>} : vector<16x128xbf16>, vector<128x128xbf16>, vector<16x128xf32> -> vector<16x128xf32>
      %31 = arith.truncf %30 : vector<16x128xf32> to vector<16x128xbf16>
      %c0_22 = arith.constant 0 : index
      %c0_23 = arith.constant 0 : index
      %32 = vector.load %arg14[%c0_22, %c0_23] : memref<128x128xbf16, #tpu.memory_space<vmem>>, vector<16x128xbf16>
      tpu.vector_store %arg14[%c0_22, %c0_23], %31 {strides = array<i32>} : memref<128x128xbf16, #tpu.memory_space<vmem>>, vector<16x128xbf16>,
      %cst_24 = arith.constant 0.000000e+00 : bf16
      %33 = vector.broadcast %cst_24 : bf16 to vector<112x128xbf16>
      %c16 = arith.constant 16 : index
      %c0_25 = arith.constant 0 : index
      %34 = vector.load %arg14[%c16, %c0_25] : memref<128x128xbf16, #tpu.memory_space<vmem>>, vector<112x128xbf16>
      tpu.vector_store %arg14[%c16, %c0_25], %33 {strides = array<i32>} : memref<128x128xbf16, #tpu.memory_space<vmem>>, vector<112x128xbf16>,
      %c0_26 = arith.constant 0 : index
      %c0_27 = arith.constant 0 : index
      %35 = vector.load %arg10[%c0_26, %c0_27] : memref<8x128xf32, #tpu.memory_space<vmem>>, vector<1x128xf32>
      %c1 = arith.constant 1 : index
      %c0_28 = arith.constant 0 : index
      %36 = vector.load %arg10[%c1, %c0_28] : memref<8x128xf32, #tpu.memory_space<vmem>>, vector<1x128xf32>
      %cst_29 = arith.constant dense<0.000000e+00> : vector<16xf32>
      %37 = vector.multi_reduction <add>, %23, %cst_29 [1] : vector<16x128xf32> to vector<16xf32>
      %38 = vector.shape_cast %37 : vector<16xf32> to vector<16x1xf32>
      %cst_30 = arith.constant 1.280000e+02 : f32
      %39 = vector.broadcast %cst_30 : f32 to vector<16x1xf32>
      %40 = arith.divf %38, %39 : vector<16x1xf32>
      %41 = vector.broadcast %40 : vector<16x1xf32> to vector<16x128xf32>
      %42 = arith.subf %23, %41 : vector<16x128xf32>
      %43 = arith.mulf %42, %42 : vector<16x128xf32>
      %cst_31 = arith.constant dense<0.000000e+00> : vector<16xf32>
      %44 = vector.multi_reduction <add>, %43, %cst_31 [1] : vector<16x128xf32> to vector<16xf32>
      %45 = vector.shape_cast %44 : vector<16xf32> to vector<16x1xf32>
      %cst_32 = arith.constant 1.280000e+02 : f32
      %46 = vector.broadcast %cst_32 : f32 to vector<16x1xf32>
      %47 = arith.divf %45, %46 : vector<16x1xf32>
      %48 = vector.broadcast %40 : vector<16x1xf32> to vector<16x128xf32>
      %49 = arith.subf %23, %48 : vector<16x128xf32>
      %cst_33 = arith.constant 9.99999974E-6 : f32
      %50 = vector.broadcast %cst_33 : f32 to vector<16x1xf32>
      %51 = arith.addf %47, %50 : vector<16x1xf32>
      %52 = math.rsqrt %51 : vector<16x1xf32>
      %53 = vector.broadcast %52 : vector<16x1xf32> to vector<16x128xf32>
      %54 = arith.mulf %49, %53 : vector<16x128xf32>
      %55 = vector.broadcast %35 : vector<1x128xf32> to vector<16x128xf32>
      %56 = arith.mulf %54, %55 : vector<16x128xf32>
      %57 = vector.broadcast %36 : vector<1x128xf32> to vector<16x128xf32>
      %58 = arith.addf %56, %57 : vector<16x128xf32>
      %cst_34 = arith.constant 0.000000e+00 : f32
      %59 = vector.broadcast %cst_34 : f32 to vector<16x128xf32>
      %60 = arith.maximumf %58, %59 : vector<16x128xf32>
      %61 = arith.truncf %60 : vector<16x128xf32> to vector<16x128xbf16>
      %c0_35 = arith.constant 0 : index
      %c0_36 = arith.constant 0 : index
      %62 = vector.load %arg5[%c0_35, %c0_36] : memref<128x384xbf16, #tpu.memory_space<vmem>>, vector<128x384xbf16>
      %cst_37 = arith.constant dense<0.000000e+00> : vector<16x384xf32>
      %63 = tpu.matmul %61, %62, %cst_37 {dimension_numbers = #tpu.dot_dimension_numbers<[1], [0], [0], [1], [0, 0, 1, 1], [], []>} : vector<16x128xbf16>, vector<128x384xbf16>, vector<16x384xf32> -> vector<16x384xf32>
      %c0_38 = arith.constant 0 : index
      %c0_39 = arith.constant 0 : index
      %64 = vector.load %arg6[%c0_38, %c0_39] : memref<1x384xf32, #tpu.memory_space<vmem>>, vector<1x384xf32>
      %65 = vector.broadcast %64 : vector<1x384xf32> to vector<16x384xf32>
      %66 = arith.addf %63, %65 : vector<16x384xf32>
      %67 = vector.extract_strided_slice %66 {offsets = [0, 0], sizes = [16, 128], strides = [1, 1]} : vector<16x384xf32> to vector<16x128xf32>
      %68 = vector.extract_strided_slice %66 {offsets = [0, 128], sizes = [16, 128], strides = [1, 1]} : vector<16x384xf32> to vector<16x128xf32>
      %69 = vector.extract_strided_slice %66 {offsets = [0, 256], sizes = [16, 128], strides = [1, 1]} : vector<16x384xf32> to vector<16x128xf32>
      %70 = arith.mulf %67, %67 : vector<16x128xf32>
      %71 = vector.shape_cast %70 : vector<16x128xf32> to vector<1x16x128xf32>
      %cst_40 = arith.constant dense<0.000000e+00> : vector<1xf32>
      %72 = vector.multi_reduction <add>, %71, %cst_40 [1, 2] : vector<1x16x128xf32> to vector<1xf32>
      %73 = vector.shape_cast %72 : vector<1xf32> to vector<1x1x1xf32>
      %74 = vector.extract %73[0, 0, 0] : f32 from vector<1x1x1xf32>
      %cst_41 = arith.constant 9.99999996E-13 : f32
      %75 = arith.addf %74, %cst_41 : f32
      %76 = math.rsqrt %75 : f32
      %77 = vector.broadcast %76 : f32 to vector<16x128xf32>
      %78 = arith.mulf %67, %77 : vector<16x128xf32>
      %79 = arith.mulf %68, %68 : vector<16x128xf32>
      %80 = vector.shape_cast %79 : vector<16x128xf32> to vector<1x16x128xf32>
      %cst_42 = arith.constant dense<0.000000e+00> : vector<1xf32>
      %81 = vector.multi_reduction <add>, %80, %cst_42 [1, 2] : vector<1x16x128xf32> to vector<1xf32>
      %82 = vector.shape_cast %81 : vector<1xf32> to vector<1x1x1xf32>
      %83 = vector.extract %82[0, 0, 0] : f32 from vector<1x1x1xf32>
      %cst_43 = arith.constant 9.99999996E-13 : f32
      %84 = arith.addf %83, %cst_43 : f32
      %85 = math.rsqrt %84 : f32
      %86 = vector.broadcast %85 : f32 to vector<16x128xf32>
      %87 = arith.mulf %68, %86 : vector<16x128xf32>
      %88 = arith.truncf %87 : vector<16x128xf32> to vector<16x128xbf16>
      %89 = arith.truncf %69 : vector<16x128xf32> to vector<16x128xbf16>
      %cst_44 = arith.constant dense<0.000000e+00> : vector<128x128xf32>
      %90 = tpu.matmul %88, %89, %cst_44 {dimension_numbers = #tpu.dot_dimension_numbers<[0], [0], [1], [1], [0, 1, 1, 1], [], []>} : vector<16x128xbf16>, vector<16x128xbf16>, vector<128x128xf32> -> vector<128x128xf32>
      %91 = arith.truncf %78 : vector<16x128xf32> to vector<16x128xbf16>
      %92 = arith.truncf %90 : vector<128x128xf32> to vector<128x128xbf16>
      %cst_45 = arith.constant dense<0.000000e+00> : vector<16x128xf32>
      %93 = tpu.matmul %91, %92, %cst_45 {dimension_numbers = #tpu.dot_dimension_numbers<[1], [0], [0], [1], [0, 0, 1, 1], [], []>} : vector<16x128xbf16>, vector<128x128xbf16>, vector<16x128xf32> -> vector<16x128xf32>
      %cst_46 = arith.constant 1.600000e+01 : f32
      %94 = vector.broadcast %cst_46 : f32 to vector<16x128xf32>
      %95 = arith.mulf %94, %69 : vector<16x128xf32>
      %96 = arith.addf %93, %95 : vector<16x128xf32>
      %cst_47 = arith.constant dense<0.000000e+00> : vector<128xf32>
      %97 = vector.multi_reduction <add>, %87, %cst_47 [0] : vector<16x128xf32> to vector<128xf32>
      %98 = vector.shape_cast %97 : vector<128xf32> to vector<1x128xf32>
      %99 = vector.broadcast %98 : vector<1x128xf32> to vector<16x128xf32>
      %100 = arith.mulf %78, %99 : vector<16x128xf32>
      %cst_48 = arith.constant dense<0.000000e+00> : vector<16xf32>
      %101 = vector.multi_reduction <add>, %100, %cst_48 [1] : vector<16x128xf32> to vector<16xf32>
      %102 = vector.shape_cast %101 : vector<16xf32> to vector<16x1xf32>
      %cst_49 = arith.constant 1.600000e+01 : f32
      %103 = vector.broadcast %cst_49 : f32 to vector<16x1xf32>
      %104 = arith.addf %102, %103 : vector<16x1xf32>
      %105 = vector.broadcast %104 : vector<16x1xf32> to vector<16x128xf32>
      %106 = arith.divf %96, %105 : vector<16x128xf32>
      %cst_50 = arith.constant 5.000000e-01 : f32
      %107 = vector.broadcast %cst_50 : f32 to vector<16x128xf32>
      %108 = arith.mulf %107, %106 : vector<16x128xf32>
      %cst_51 = arith.constant 5.000000e-01 : f32
      %109 = vector.broadcast %cst_51 : f32 to vector<16x128xf32>
      %110 = arith.mulf %109, %60 : vector<16x128xf32>
      %111 = arith.addf %108, %110 : vector<16x128xf32>
      %c2 = arith.constant 2 : index
      %c0_52 = arith.constant 0 : index
      %112 = vector.load %arg10[%c2, %c0_52] : memref<8x128xf32, #tpu.memory_space<vmem>>, vector<1x128xf32>
      %c3 = arith.constant 3 : index
      %c0_53 = arith.constant 0 : index
      %113 = vector.load %arg10[%c3, %c0_53] : memref<8x128xf32, #tpu.memory_space<vmem>>, vector<1x128xf32>
      %cst_54 = arith.constant dense<0.000000e+00> : vector<16xf32>
      %114 = vector.multi_reduction <add>, %111, %cst_54 [1] : vector<16x128xf32> to vector<16xf32>
      %115 = vector.shape_cast %114 : vector<16xf32> to vector<16x1xf32>
      %cst_55 = arith.constant 1.280000e+02 : f32
      %116 = vector.broadcast %cst_55 : f32 to vector<16x1xf32>
      %117 = arith.divf %115, %116 : vector<16x1xf32>
      %118 = vector.broadcast %117 : vector<16x1xf32> to vector<16x128xf32>
      %119 = arith.subf %111, %118 : vector<16x128xf32>
      %120 = arith.mulf %119, %119 : vector<16x128xf32>
      %cst_56 = arith.constant dense<0.000000e+00> : vector<16xf32>
      %121 = vector.multi_reduction <add>, %120, %cst_56 [1] : vector<16x128xf32> to vector<16xf32>
      %122 = vector.shape_cast %121 : vector<16xf32> to vector<16x1xf32>
      %cst_57 = arith.constant 1.280000e+02 : f32
      %123 = vector.broadcast %cst_57 : f32 to vector<16x1xf32>
      %124 = arith.divf %122, %123 : vector<16x1xf32>
      %125 = vector.broadcast %117 : vector<16x1xf32> to vector<16x128xf32>
      %126 = arith.subf %111, %125 : vector<16x128xf32>
      %cst_58 = arith.constant 9.99999974E-6 : f32
      %127 = vector.broadcast %cst_58 : f32 to vector<16x1xf32>
      %128 = arith.addf %124, %127 : vector<16x1xf32>
      %129 = math.rsqrt %128 : vector<16x1xf32>
      %130 = vector.broadcast %129 : vector<16x1xf32> to vector<16x128xf32>
      %131 = arith.mulf %126, %130 : vector<16x128xf32>
      %132 = vector.broadcast %112 : vector<1x128xf32> to vector<16x128xf32>
      %133 = arith.mulf %131, %132 : vector<16x128xf32>
      %134 = vector.broadcast %113 : vector<1x128xf32> to vector<16x128xf32>
      %135 = arith.addf %133, %134 : vector<16x128xf32>
      %cst_59 = arith.constant 0.000000e+00 : f32
      %136 = vector.broadcast %cst_59 : f32 to vector<16x128xf32>
      %137 = arith.maximumf %135, %136 : vector<16x128xf32>
      %138 = arith.truncf %137 : vector<16x128xf32> to vector<16x128xbf16>
      %c0_60 = arith.constant 0 : index
      %c0_61 = arith.constant 0 : index
      %139 = vector.load %arg12[%c0_60, %c0_61] : memref<16x128xbf16, #tpu.memory_space<vmem>>, vector<16x128xbf16>
      tpu.vector_store %arg12[%c0_60, %c0_61], %138 {strides = array<i32>} : memref<16x128xbf16, #tpu.memory_space<vmem>>, vector<16x128xbf16>,
      %cst_62 = arith.constant 0.000000e+00 : f32
      %140 = vector.broadcast %cst_62 : f32 to vector<16x128xf32>
      %c0_63 = arith.constant 0 : index
      %c0_64 = arith.constant 0 : index
      %141 = vector.load %arg15[%c0_63, %c0_64] : memref<16x128xf32, #tpu.memory_space<vmem>>, vector<16x128xf32>
      tpu.vector_store %arg15[%c0_63, %c0_64], %140 {strides = array<i32>} : memref<16x128xf32, #tpu.memory_space<vmem>>, vector<16x128xf32>,
    } else {
    }
    %c128_i32 = arith.constant 128 : i32
    %3 = arith.muli %arg0, %c128_i32 : i32
    %4 = tpu.assume_multiple %3, 128 : i32
    %c0 = arith.constant 0 : index
    %c0_1 = arith.constant 0 : index
    %5 = vector.load %arg15[%c0, %c0_1] : memref<16x128xf32, #tpu.memory_space<vmem>>, vector<16x128xf32>
    %c0_2 = arith.constant 0 : index
    %c0_3 = arith.constant 0 : index
    %6 = vector.load %arg2[%c0_2, %c0_3] : memref<16x128xbf16, #tpu.memory_space<vmem>>, vector<16x128xbf16>
    %7 = arith.index_cast %4 : i32 to index
    %c0_4 = arith.constant 0 : index
    %8 = vector.load %arg14[%7, %c0_4] : memref<128x128xbf16, #tpu.memory_space<vmem>>, vector<128x128xbf16>
    %cst = arith.constant dense<0.000000e+00> : vector<16x128xf32>
    %9 = tpu.matmul %6, %8, %cst {dimension_numbers = #tpu.dot_dimension_numbers<[1], [0], [0], [1], [0, 0, 1, 1], [], []>} : vector<16x128xbf16>, vector<128x128xbf16>, vector<16x128xf32> -> vector<16x128xf32>
    %10 = arith.addf %5, %9 : vector<16x128xf32>
    %c0_5 = arith.constant 0 : index
    %c0_6 = arith.constant 0 : index
    %11 = vector.load %arg15[%c0_5, %c0_6] : memref<16x128xf32, #tpu.memory_space<vmem>>, vector<16x128xf32>
    tpu.vector_store %arg15[%c0_5, %c0_6], %10 {strides = array<i32>} : memref<16x128xf32, #tpu.memory_space<vmem>>, vector<16x128xf32>,
    %c0_i32_7 = arith.constant 0 : i32
    %12 = arith.cmpi eq, %arg0, %c0_i32_7 : i32
    %13 = arith.extui %12 : i1 to i32
    %c0_i32_8 = arith.constant 0 : i32
    %14 = arith.cmpi ne, %13, %c0_i32_8 : i32
    scf.if %14 {
      %c0_9 = arith.constant 0 : index
      %c0_10 = arith.constant 0 : index
      %15 = vector.load %arg13[%c0_9, %c0_10] : memref<16x128xbf16, #tpu.memory_space<vmem>>, vector<16x128xbf16>
      %16 = arith.extf %15 : vector<16x128xbf16> to vector<16x128xf32>
      %c0_11 = arith.constant 0 : index
      %c0_12 = arith.constant 0 : index
      %17 = vector.load %arg15[%c0_11, %c0_12] : memref<16x128xf32, #tpu.memory_space<vmem>>, vector<16x128xf32>
      %c4 = arith.constant 4 : index
      %c0_13 = arith.constant 0 : index
      %18 = vector.load %arg10[%c4, %c0_13] : memref<8x128xf32, #tpu.memory_space<vmem>>, vector<1x128xf32>
      %19 = vector.broadcast %18 : vector<1x128xf32> to vector<16x128xf32>
      %20 = arith.addf %17, %19 : vector<16x128xf32>
      %cst_14 = arith.constant 0.000000e+00 : f32
      %21 = vector.broadcast %cst_14 : f32 to vector<16x128xf32>
      %22 = arith.maximumf %20, %21 : vector<16x128xf32>
      %23 = arith.addf %22, %16 : vector<16x128xf32>
      %cst_15 = arith.constant 8.000000e-01 : f32
      %24 = vector.broadcast %cst_15 : f32 to vector<16x128xf32>
      %25 = arith.mulf %24, %23 : vector<16x128xf32>
      %c0_16 = arith.constant 0 : index
      %c0_17 = arith.constant 0 : index
      %26 = vector.load %arg12[%c0_16, %c0_17] : memref<16x128xbf16, #tpu.memory_space<vmem>>, vector<16x128xbf16>
      %27 = arith.extf %26 : vector<16x128xbf16> to vector<16x128xf32>
      %cst_18 = arith.constant 2.000000e-01 : f32
      %28 = vector.broadcast %cst_18 : f32 to vector<16x128xf32>
      %29 = arith.mulf %28, %27 : vector<16x128xf32>
      %30 = arith.addf %25, %29 : vector<16x128xf32>
      %31 = arith.truncf %30 : vector<16x128xf32> to vector<16x128xbf16>
      %c0_19 = arith.constant 0 : index
      %c0_20 = arith.constant 0 : index
      %32 = vector.load %arg8[%c0_19, %c0_20] : memref<128x128xbf16, #tpu.memory_space<vmem>>, vector<128x128xbf16>
      %cst_21 = arith.constant dense<0.000000e+00> : vector<16x128xf32>
      %33 = tpu.matmul %31, %32, %cst_21 {dimension_numbers = #tpu.dot_dimension_numbers<[1], [0], [0], [1], [0, 0, 1, 1], [], []>} : vector<16x128xbf16>, vector<128x128xbf16>, vector<16x128xf32> -> vector<16x128xf32>
      %c0_22 = arith.constant 0 : index
      %c0_23 = arith.constant 0 : index
      %34 = vector.load %arg9[%c0_22, %c0_23] : memref<1x128xf32, #tpu.memory_space<vmem>>, vector<1x128xf32>
      %35 = vector.broadcast %34 : vector<1x128xf32> to vector<16x128xf32>
      %36 = arith.addf %33, %35 : vector<16x128xf32>
      %c0_24 = arith.constant 0 : index
      %c0_25 = arith.constant 0 : index
      %37 = vector.load %arg11[%c0_24, %c0_25] : memref<16x128xf32, #tpu.memory_space<vmem>>, vector<16x128xf32>
      tpu.vector_store %arg11[%c0_24, %c0_25], %36 {strides = array<i32>} : memref<16x128xf32, #tpu.memory_space<vmem>>, vector<16x128xf32>,
    } else {
    }
    return
  }
  func.func @transform_0(%arg0: i32) -> (i32, i32) {
    %c0_i32 = arith.constant 0 : i32
    %c0_i32_0 = arith.constant 0 : i32
    %c0_i32_1 = arith.constant 0 : i32
    return %c0_i32, %c0_i32_0 : i32, i32
  }
  func.func @transform_1(%arg0: i32) -> (i32, i32) {
    %c0_i32 = arith.constant 0 : i32
    %c0_i32_0 = arith.constant 0 : i32
    return %c0_i32, %arg0 : i32, i32
  }
  func.func @transform_2(%arg0: i32) -> (i32, i32) {
    %c0_i32 = arith.constant 0 : i32
    %c0_i32_0 = arith.constant 0 : i32
    %c0_i32_1 = arith.constant 0 : i32
    return %c0_i32, %c0_i32_0 : i32, i32
  }
  func.func @transform_3(%arg0: i32) -> (i32, i32) {
    %c0_i32 = arith.constant 0 : i32
    %c0_i32_0 = arith.constant 0 : i32
    %c0_i32_1 = arith.constant 0 : i32
    return %c0_i32, %c0_i32_0 : i32, i32
  }
  func.func @transform_4(%arg0: i32) -> (i32, i32) {
    %c0_i32 = arith.constant 0 : i32
    %c0_i32_0 = arith.constant 0 : i32
    %c0_i32_1 = arith.constant 0 : i32
    return %c0_i32, %c0_i32_0 : i32, i32
  }
  func.func @transform_5(%arg0: i32) -> (i32, i32) {
    %c0_i32 = arith.constant 0 : i32
    %c0_i32_0 = arith.constant 0 : i32
    %c0_i32_1 = arith.constant 0 : i32
    return %c0_i32, %c0_i32_0 : i32, i32
  }
  func.func @transform_6(%arg0: i32) -> (i32, i32) {
    %c0_i32 = arith.constant 0 : i32
    %c0_i32_0 = arith.constant 0 : i32
    %c0_i32_1 = arith.constant 0 : i32
    return %c0_i32, %c0_i32_0 : i32, i32
  }
  func.func @transform_7(%arg0: i32) -> (i32, i32) {
    %c0_i32 = arith.constant 0 : i32
    %c0_i32_0 = arith.constant 0 : i32
    %c0_i32_1 = arith.constant 0 : i32
    return %c0_i32, %c0_i32_0 : i32, i32
  }
  func.func @transform_8(%arg0: i32) -> (i32, i32) {
    %c0_i32 = arith.constant 0 : i32
    %c0_i32_0 = arith.constant 0 : i32
    %c0_i32_1 = arith.constant 0 : i32
    return %c0_i32, %c0_i32_0 : i32, i32
  }
  func.func @transform_9(%arg0: i32) -> (i32, i32) {
    %c0_i32 = arith.constant 0 : i32
    %c0_i32_0 = arith.constant 0 : i32
    %c0_i32_1 = arith.constant 0 : i32
    return %c0_i32, %c0_i32_0 : i32, i32
  }
  func.func @transform_10(%arg0: i32) -> (i32, i32) {
    %c0_i32 = arith.constant 0 : i32
    %c0_i32_0 = arith.constant 0 : i32
    %c0_i32_1 = arith.constant 0 : i32
    return %c0_i32, %c0_i32_0 : i32, i32
  }
}

</mosaic_0001>

<bundles_post_ra>
// kernel: tpu_custom_call.1
= control target key start
LH: loop header
LB: loop body
LE: loop exit
PB: predicated region body
PF: predicated region fallthrough
CT: control target
= control target key end

     0   :  { %15 = vsyncpa [#allocation7], 0  ;;  %s1816_s0 = inlined_call_operand.vmem [shape: f32[16,8], index: 0, kind: input, shape index: {}]   ;;  %s1817_s1 = inlined_call_operand.vmem [shape: bf16[16,128], index: 1, kind: input, shape index: {}]   ;;  %s1818_s2 = inlined_call_operand.vmem [shape: f32[8,256], index: 2, kind: input, shape index: {}]   ;;  %s1819_s3 = inlined_call_operand.hbm [shape: f32[1,256], index: 3, kind: input, shape index: {}]   ;;  %s1820_s4 = inlined_call_operand.hbm [shape: bf16[128,384], index: 4, kind: input, shape index: {}]   ;;  %s1821_s5 = inlined_call_operand.vmem [shape: f32[1,384], index: 5, kind: input, shape index: {}]   ;;  %s1822_s6 = inlined_call_operand.hbm [shape: bf16[128,128], index: 6, kind: input, shape index: {}]   ;;  %s1823_s7 = inlined_call_operand.hbm [shape: bf16[128,128], index: 7, kind: input, shape index: {}]   ;;  %s1824_s8 = inlined_call_operand.vmem [shape: f32[1,128], index: 8, kind: input, shape index: {}]   ;;  %s1825_s9 = inlined_call_operand.vmem [shape: f32[8,128], index: 9, kind: input, shape index: {}]   ;;  %s1826_s10 = inlined_call_operand.hbm [shape: f32[16,128], index: 10, kind: output, shape index: {}]  }
   0x1   :  { %16 = vsyncpa [#allocation10], 0 }
   0x2   :  { %17 = vsyncpa [#allocation13], 0 }
   0x3   :  { %18 = vsyncpa [#allocation8], 0  ;;  %s1528_s13 = smov [#allocation9]   ;;  %s1410_s17 = scalar_lea.hbm %s1820_s4, 3072 }
   0x4   :  { %s40_s14 = sshll.u32 %s1528_s13, 4  ;;  %p1411_p0 = scmp.ne.s32.totalorder %s1820_s4, %s1410_s17  ;;  %s41_s14 = int_to_ptr.vmem [resolvable:$true] %s40_s14 }
   0x5   :  { %p1414_p1 = scmp.lt.u32.totalorder %s1410_s17, %s1820_s4 }
   0x7   :  { %p1416_p2 = pnand %p1414_p1, %p1411_p0 }
   0x9   :  { %1419 = shalt.err (!%p1416_p2)
}
   0xa   :  { %s1420_s22 = scalar_lea.vmem %s41_s14, 3072  ;;  %p1425_p4 = scmp.lt.s32.totalorder %s41_s14, %s41_s14 }
   0xb   :  { %p1421_p3 = scmp.ne.s32.totalorder %s41_s14, %s1420_s22  ;;  %p1426_p5 = scmp.lt.s32.totalorder %s1420_s22, %s1420_s22 }
   0xd   :  { %p1427_p6 = por %p1426_p5, %p1425_p4 }
   0xf   :  { %p1428_p7 = pnand %p1427_p6, %p1421_p3 }
  0x11   :  { %1431 = shalt.err (!%p1428_p7)
}
  0x12   :  { %s1529_s23 = smov 192   ;;  %s1530_s24 = smov 12  }
  0x13   :  { %46 = dma.hbm_to_vmem [thread:$0]  %s1820_s4, 3072, %s41_s14, [#allocation10], %s1529_s23, %s1529_s23, %s1530_s24  }
  0x14   :  { %s1531_s27 = smov [#allocation6]   ;;  %s1532_s29 = smov [#allocation11]  }
  0x15   :  { %s31_s28 = sshll.u32 %s1531_s27, 4  ;;  %s54_s30 = sshll.u32 %s1532_s29, 4  ;;  %s32_s28 = int_to_ptr.vmem [resolvable:$true] %s31_s28  ;;  %s55_s30 = int_to_ptr.vmem [resolvable:$true] %s54_s30 }
  0x16   :  { %s1432_s13 = scalar_lea.hbm %s1819_s3, 32 }
  0x17   :  { %p1433_p8 = scmp.ne.s32.totalorder %s1819_s3, %s1432_s13  ;;  %p1436_p9 = scmp.lt.u32.totalorder %s1432_s13, %s1819_s3 }
  0x19   :  { %p1438_p10 = pnand %p1436_p9, %p1433_p8 }
  0x1b   :  { %1441 = shalt.err (!%p1438_p10)
}
  0x1c   :  { %s1442_s4 = scalar_lea.vmem %s32_s28, 32  ;;  %p1447_p12 = scmp.lt.s32.totalorder %s32_s28, %s32_s28 }
  0x1d   :  { %p1443_p11 = scmp.ne.s32.totalorder %s32_s28, %s1442_s4  ;;  %p1448_p13 = scmp.lt.s32.totalorder %s1442_s4, %s1442_s4 }
  0x1f   :  { %p1449_p0 = por %p1448_p13, %p1447_p12 }
  0x21   :  { %p1450_p1 = pnand %p1449_p0, %p1443_p11 }
  0x23   :  { %1453 = shalt.err (!%p1450_p1)
}
  0x24   :  { %34 = dma.hbm_to_vmem [thread:$0]  %s1819_s3, 32, %s32_s28, [#allocation7]  }
  0x25   :  { %s1454_s22 = scalar_lea.hbm %s1822_s6, 1024 }
  0x26   :  { %p1455_p2 = scmp.ne.s32.totalorder %s1822_s6, %s1454_s22  ;;  %p1458_p3 = scmp.lt.u32.totalorder %s1454_s22, %s1822_s6 }
  0x28   :  { %p1460_p4 = pnand %p1458_p3, %p1455_p2 }
  0x2a   :  { %1463 = shalt.err (!%p1460_p4)
}
  0x2b   :  { %s1464_s27 = scalar_lea.vmem %s55_s30, 1024  ;;  %p1469_p6 = scmp.lt.s32.totalorder %s55_s30, %s55_s30 }
  0x2c   :  { %p1465_p5 = scmp.ne.s32.totalorder %s55_s30, %s1464_s27  ;;  %p1470_p7 = scmp.lt.s32.totalorder %s1464_s27, %s1464_s27 }
  0x2e   :  { %p1471_p8 = por %p1470_p7, %p1469_p6 }
  0x30   :  { %p1472_p9 = pnand %p1471_p8, %p1465_p5 }
  0x32   :  { %1475 = shalt.err (!%p1472_p9)
}
  0x33   :  { %s1533_s3 = smov 64   ;;  %s1534_s28 = smov 4  }
  0x34   :  { %60 = dma.hbm_to_vmem [thread:$0]  %s1822_s6, 1024, %s55_s30, [#allocation10], %s1533_s3, %s1533_s3, %s1534_s28  }
  0x35   :  { %s1535_s12 = smov [#allocation12]   ;;  %s1476_s17 = scalar_lea.hbm %s1823_s7, 1024 }
  0x36   :  { %s66_s13 = sshll.u32 %s1535_s12, 4  ;;  %p1477_p10 = scmp.ne.s32.totalorder %s1823_s7, %s1476_s17  ;;  %s67_s13 = int_to_ptr.vmem [resolvable:$true] %s66_s13 }
  0x37   :  { %p1480_p11 = scmp.lt.u32.totalorder %s1476_s17, %s1823_s7 }
  0x39   :  { %p1482_p12 = pnand %p1480_p11, %p1477_p10 }
  0x3b   :  { %1485 = shalt.err (!%p1482_p12)
}
  0x3c   :  { %s1486_s20 = scalar_lea.vmem %s67_s13, 1024  ;;  %p1491_p0 = scmp.lt.s32.totalorder %s67_s13, %s67_s13 }
  0x3d   :  { %p1487_p13 = scmp.ne.s32.totalorder %s67_s13, %s1486_s20  ;;  %p1492_p1 = scmp.lt.s32.totalorder %s1486_s20, %s1486_s20 }
  0x3f   :  { %p1493_p2 = por %p1492_p1, %p1491_p0 }
  0x41   :  { %p1494_p3 = pnand %p1493_p2, %p1487_p13 }
  0x43   :  { %1497 = shalt.err (!%p1494_p3)
}
  0x44   :  { %72 = dma.hbm_to_vmem [thread:$0]  %s1823_s7, 1024, %s67_s13, [#allocation13], %s1533_s3, %s1533_s3, %s1534_s28  }
  0x45   :  { %1520 = dma.done.wait [#allocation7], 32  }
  0x46   :  { %1521 = vsyncadd [#allocation7], 4294967264 }
  0x47   :  { %1522 = dma.done.wait [#allocation10], 4096  }
  0x48   :  { %1523 = vsyncadd [#allocation10], 4294963200 }
  0x49   :  { %1524 = dma.done.wait [#allocation13], 1024  }
  0x4a   :  { %1525 = vsyncadd [#allocation13], 4294966272  ;;  %v1536_v0 = vmov 0   ;;  %v1537_v1 = vmov 0.0   ;;  %v98_v2 = vld [vmem:[%s1818_s2 + $0x8] sm:$0xff]  ;;  %vm117_vm0 = vcmask 1043456   ;;  %v103_v18 = vlaneseq }
  0x4b   :  { %156 = vmatprep.mubr.bf16.mxu0 %v1536_v0  ;;  %1219 = vmatprep.subr.bf16.mxu1 %v1537_v1  ;;  %v97_v3 = vld [vmem:[%s1818_s2] sm:$0xff]  ;;  %v100_v5 = vpack.c.bf16 %v98_v2, %v98_v2  ;;  %v95_v7 = vld [vmem:[%s1816_s0 + $0x8] sm:$0xff]  ;;  %vm113_vm1 = vcmask 64512   ;;  %v1347_v12 = vld [vmem:[#allocation11 + $0x10] sm:$0xff]   ;;  %vm1538_vm2 = vmmov 0   ;;  %vm642_vm3 = vcmask 130048  }
  0x4c   :  { %v94_v4 = vld [vmem:[%s1816_s0] sm:$0xff]  ;;  %v99_v6 = vpack.c.bf16 %v97_v3, %v97_v3  ;;  %v1346_v11 = vld [vmem:[#allocation11 + $0x8] sm:$0xff]   ;;  %v1351_v16 = vld [vmem:[#allocation11 + $0x30] sm:$0xff]   ;;  %1235 = vmatprep.mubr.msk.bf16.mxu1 %vm1538_vm2, %v1537_v1  ;;  %v1668_v19 = vshrl.u32 %v103_v18, 7 }
  0x4d   :  { %v1345_v8 = vld [vmem:[#allocation11] sm:$0xff]   ;;  %1115 = vmatprep.subr.msk.bf16.mxu0 %vm117_vm0, %v100_v5  ;;  %v96_v10 = vpack.c.bf16 %v95_v7, %v94_v4  ;;  %v1348_v13 = vld [vmem:[#allocation11 + $0x18] sm:$0xff]   ;;  %v1350_v15 = vld [vmem:[#allocation11 + $0x28] sm:$0xff]  }
  0x4e   :  { %v119_v9 = vsel %vm117_vm0, %v99_v6, 0  ;;  %1220 = vmatpush3.bf16.msra.mxu1 %v1345_v8  ;;  %v1349_v14 = vld [vmem:[#allocation11 + $0x20] sm:$0xff]   ;;  %v1352_v17 = vld [vmem:[#allocation11 + $0x38] sm:$0xff]   ;;  %v105_v20 = vsub.s32 0, %v1668_v19  ;;  %v109_v22 = vsub.s32 1, %v1668_v19 }
  0x4f   :  { %125 = vmatpush1.bf16.msra.mxu0 %v119_v9  ;;  %1221 = vmatprep.subr.bf16.mxu1 %v1537_v1  ;;  %v101_v21 = vld [vmem:[#allocation6] sm:$0x3]  ;;  %v1353_v36 = vld [vmem:[#allocation9] ss:$12 sps:$4 sm:$0xff]   ;;  %v1355_v37 = vld [vmem:[#allocation9 + $0x4] ss:$12 sps:$4 sm:$0xff]  }
  0x50   :  { %v106_v23 = vrot.slane %v101_v21, %v105_v20  ;;  %v110_v24 = vrot.slane %v101_v21, %v109_v22  ;;  %v1356_v38 = vld [vmem:[#allocation9 + $0x8] ss:$12 sps:$4 sm:$0xff]   ;;  %502 = vmatprep.subr.bf16.mxu0 %v1355_v37  ;;  %v1357_v48 = vld [vmem:[#allocation9 + $0x18] ss:$12 sps:$4 sm:$0xff]   ;;  %v1360_v49 = vld [vmem:[#allocation9 + $0x20] ss:$12 sps:$4 sm:$0xff]  }
  0x51   :  { %v1359_v47 = vld [vmem:[#allocation9 + $0x1c] ss:$12 sps:$4 sm:$0xff]   ;;  %v1363_v50 = vld [vmem:[#allocation9 + $0x34] ss:$12 sps:$4 sm:$0xff]   ;;  %v1364_v52 = vld [vmem:[#allocation9 + $0x38] ss:$12 sps:$4 sm:$0xff]  }
  0x52   :  { %1116 = vmatmul.mubr.msk.bf16.vlgmr.msra.gmra.mrb[0].mxu0 %vm113_vm1, %v96_v10  ;;  %1222 = vmatpush3.bf16.msra.mxu1 %v1346_v11  ;;  %v1361_v51 = vld [vmem:[#allocation9 + $0x30] ss:$12 sps:$4 sm:$0xff]   ;;  %v1367_v53 = vld [vmem:[#allocation9 + $0x4c] ss:$12 sps:$4 sm:$0xff]   ;;  %v1365_v54 = vld [vmem:[#allocation9 + $0x48] ss:$12 sps:$4 sm:$0xff]  }
  0x53   :  { %534 = vmatprep.mubr.bf16.mxu0 %v1536_v0  ;;  %1223 = vmatprep.subr.bf16.mxu1 %v1537_v1  ;;  %v1368_v55 = vld [vmem:[#allocation9 + $0x50] ss:$12 sps:$4 sm:$0xff]   ;;  %v1369_v57 = vld [vmem:[#allocation9 + $0x60] ss:$12 sps:$4 sm:$0xff]   ;;  %v1372_v58 = vld [vmem:[#allocation9 + $0x68] ss:$12 sps:$4 sm:$0xff]  }
  0x54   :  { %503 = vmatpush1.bf16.msra.mxu0 %v1353_v36  ;;  %v1371_v56 = vld [vmem:[#allocation9 + $0x64] ss:$12 sps:$4 sm:$0xff]   ;;  %v1375_v59 = vld [vmem:[#allocation9 + $0x7c] ss:$12 sps:$4 sm:$0xff]   ;;  %v1376_v61 = vld [vmem:[#allocation9 + $0x80] ss:$12 sps:$4 sm:$0xff]  }
  0x55   :  { %504 = vmatprep.subr.bf16.mxu0 %v1359_v47  ;;  %v1373_v60 = vld [vmem:[#allocation9 + $0x78] ss:$12 sps:$4 sm:$0xff]   ;;  %v1377_v62 = vld [vmem:[#allocation9 + $0x90] ss:$12 sps:$4 sm:$0xff]   ;;  %v1379_v63 = vld [vmem:[#allocation9 + $0x94] ss:$12 sps:$4 sm:$0xff]  }
  0x56   :  { %1224 = vmatpush3.bf16.msra.mxu1 %v1347_v12  ;;  %v1380_v0 = vld [vmem:[#allocation9 + $0x98] ss:$12 sps:$4 sm:$0xff]   ;;  %v1381_v3 = vld [vmem:[#allocation9 + $0xa8] ss:$12 sps:$4 sm:$0xff]   ;;  %v1384_v4 = vld [vmem:[#allocation9 + $0xb0] ss:$12 sps:$4 sm:$0xff]  }
  0x57   :  { %1225 = vmatprep.subr.bf16.mxu1 %v1537_v1  ;;  %v1383_v2 = vld [vmem:[#allocation9 + $0xac] ss:$12 sps:$4 sm:$0xff]  }
  0x58   :  { %505 = vmatpush1.bf16.msra.mxu0 %v1357_v48 }
  0x59   :  { %506 = vmatprep.subr.bf16.mxu0 %v1363_v50 }
  0x5a   :  { %1226 = vmatpush3.bf16.msra.mxu1 %v1348_v13 }
  0x5b   :  { %1227 = vmatprep.subr.bf16.mxu1 %v1537_v1 }
  0x5c   :  { %507 = vmatpush1.bf16.msra.mxu0 %v1361_v51 }
  0x5d   :  { %508 = vmatprep.subr.bf16.mxu0 %v1367_v53 }
  0x5e   :  { %1228 = vmatpush3.bf16.msra.mxu1 %v1349_v14 }
  0x5f   :  { %1229 = vmatprep.subr.bf16.mxu1 %v1537_v1 }
  0x60   :  { %509 = vmatpush1.bf16.msra.mxu0 %v1365_v54 }
  0x61   :  { %510 = vmatprep.subr.bf16.mxu0 %v1371_v56 }
  0x62   :  { %1230 = vmatpush3.bf16.msra.mxu1 %v1350_v15 }
  0x63   :  { %1231 = vmatprep.subr.bf16.mxu1 %v1537_v1 }
  0x64   :  { %511 = vmatpush1.bf16.msra.mxu0 %v1369_v57 }
  0x65   :  { %512 = vmatprep.subr.bf16.mxu0 %v1375_v59 }
  0x66   :  { %1232 = vmatpush3.bf16.msra.mxu1 %v1351_v16 }
  0x67   :  { %1233 = vmatprep.subr.bf16.mxu1 %v1537_v1 }
  0x68   :  { %513 = vmatpush1.bf16.msra.mxu0 %v1373_v60 }
  0x69   :  { %514 = vmatprep.subr.bf16.mxu0 %v1379_v63 }
  0x6a   :  { %1234 = vmatpush3.bf16.msra.mxu1 %v1352_v17  ;;  %v1125_v17 = vld [vmem:[%s1825_s9] ss:$0 sm:$0xff] }
  0x6b   :  { %1239 = vmatprep.subr.bf16.mxu1 %v1537_v1 }
  0x6c   :  { %515 = vmatpush1.bf16.msra.mxu0 %v1377_v62 }
  0x6d   :  { %516 = vmatprep.subr.bf16.mxu0 %v1383_v2 }
  0x70   :  { %517 = vmatpush1.bf16.msra.mxu0 %v1381_v3 }
 0x125   :  { %v158_v25 = vpop.f32.mrb[0].mxu0 }
 0x126   :  { %v159_v26 = vadd.f32 %v158_v25, %v106_v23  ;;  %v160_v27 = vpop.f32.mrb[1].mxu0 }
 0x127   :  { %v161_v28 = vadd.f32 %v160_v27, %v110_v24  ;;  %v162_v29 = vpop.f32.mrb[2].mxu0 }
 0x128   :  { %v164_v30 = vpop.f32.mrb[3].mxu0  ;;  %287 = vadd.xlane.f32.xlu0 %v159_v26  ;;  %v163_v32 = vadd.f32 %v162_v29, %v106_v23 }
 0x129   :  { %v165_v31 = vadd.f32 %v164_v30, %v110_v24  ;;  %v167_v33 = vmax.f32 %v161_v28, 0.0  ;;  %v1126_v24 = vld [vmem:[%s1825_s9 + $0x1] ss:$0 sm:$0xff] }
 0x12b   :  { %v168_v34 = vmax.f32 %v165_v31, 0.0 }
 0x12c   :  { %289 = vadd.xlane.f32.xlu0 %v163_v32 }
 0x12d   :  { %v1676_v35 = vpack.c.bf16 %v168_v34, %v167_v33  ;;  %v369_v33 = vsub.s32 2, %v1668_v19 }
 0x12f   :  { %1236 = vmatmul.mubr.bf16.vlgmr.msra.gmra.mrb[0].mxu1 %v1676_v35 }
 0x130   :  { %1255 = vmatprep.mubr.msk.bf16.mxu1 %vm1538_vm2, %v1537_v1  ;;  %1240 = vmatpush3.bf16.msra.mxu1 %v1356_v38 }
 0x131   :  { %1241 = vmatprep.subr.bf16.mxu1 %v1537_v1 }
 0x134   :  { %1242 = vmatpush3.bf16.msra.mxu1 %v1360_v49 }
 0x135   :  { %1243 = vmatprep.subr.bf16.mxu1 %v1537_v1 }
 0x138   :  { %1244 = vmatpush3.bf16.msra.mxu1 %v1364_v52 }
 0x139   :  { %1245 = vmatprep.subr.bf16.mxu1 %v1537_v1 }
 0x13c   :  { %1246 = vmatpush3.bf16.msra.mxu1 %v1368_v55 }
 0x13d   :  { %1247 = vmatprep.subr.bf16.mxu1 %v1537_v1 }
 0x140   :  { %1248 = vmatpush3.bf16.msra.mxu1 %v1372_v58 }
 0x141   :  { %1249 = vmatprep.subr.bf16.mxu1 %v1537_v1 }
 0x144   :  { %1250 = vmatpush3.bf16.msra.mxu1 %v1376_v61 }
 0x145   :  { %1251 = vmatprep.subr.bf16.mxu1 %v1537_v1 }
 0x148   :  { %1252 = vmatpush3.bf16.msra.mxu1 %v1380_v0 }
 0x149   :  { %1253 = vmatprep.subr.bf16.mxu1 %v1537_v1 }
 0x14c   :  { %1254 = vmatpush3.bf16.msra.mxu1 %v1384_v4 }
 0x14d   :  { %1303 = vmatprep.subr.bf16.mxu1 %v1537_v1 }
 0x1b5   :  { %v288_v39 = vpop.xlane.xlu0 %287 }
 0x1b6   :  { %v292_v40 = vmul.f32 0.0078125, %v288_v39 }
 0x1b8   :  { %v1682_v41 = vsub.f32 %v159_v26, %v292_v40 }
 0x1b9   :  { %v290_v42 = vpop.xlane.xlu0 %289 }
 0x1ba   :  { %v293_v43 = vmul.f32 0.0078125, %v290_v42  ;;  %v296_v44 = vmul.f32 %v1682_v41, %v1682_v41 }
 0x1bc   :  { %v1686_v45 = vsub.f32 %v163_v32, %v293_v43  ;;  %298 = vadd.xlane.f32.xlu1 %v296_v44  ;;  %v357_v32 = vld [vmem:[%s1821_s5] sm:$0x7] }
 0x1bd   :  { %v362_v34 = vrot.slane %v357_v32, %v105_v20  ;;  %v366_v36 = vrot.slane %v357_v32, %v109_v22  ;;  %v370_v37 = vrot.slane %v357_v32, %v369_v33 }
 0x1be   :  { %v297_v46 = vmul.f32 %v1686_v45, %v1686_v45 }
 0x1c0   :  { %300 = vadd.xlane.f32.xlu1 %v297_v46 }
 0x202   :  { %v1697_v5 = vpop.f32.mrb[0].mxu1 }
 0x203   :  { %v1237_v6 = vpop.f32.mrb[1].mxu1 }
 0x204   :  { %v1699_v7 = vpop.f32.mrb[2].mxu1 }
 0x205   :  { %v276_v8 = vpack.c.bf16 %v1699_v7, %v1697_v5  ;;  %v1238_v9 = vpop.f32.mrb[3].mxu1 }
 0x249   :  { %v299_v10 = vpop.xlane.xlu1 %298 }
 0x24a   :  { %v302_v11 = vmul.f32 0.0078125, %v299_v10 }
 0x24c   :  { %v304_v12 = vadd.f32 1e-05, %v302_v11 }
 0x24d   :  { %v301_v13 = vpop.xlane.xlu1 %300 }
 0x24e   :  { %1394 = vrsqrt.f32 %v304_v12  ;;  %v303_v14 = vmul.f32 0.0078125, %v301_v13 }
 0x250   :  { %v305_v15 = vadd.f32 1e-05, %v303_v14 }
 0x252   :  { %1396 = vrsqrt.f32 %v305_v15 }
 0x258   :  { %v1395_v16 = vpop.eup %1394 }
 0x259   :  { %v308_v18 = vmul.f32 %v1395_v16, %v1682_v41 }
 0x25b   :  { %v314_v21 = vmul.f32 %v1125_v17, %v308_v18 }
 0x25c   :  { %v1397_v23 = vpop.eup %1396 }
 0x25d   :  { %v309_v25 = vmul.f32 %v1397_v23, %v1686_v45  ;;  %v1711_v27 = vadd.f32 %v1126_v24, %v314_v21 }
 0x25f   :  { %v315_v26 = vmul.f32 %v1125_v17, %v309_v25  ;;  %v322_v29 = vmax.f32 %v1711_v27, 0.0 }
 0x261   :  { %v1713_v28 = vadd.f32 %v1126_v24, %v315_v26 }
 0x263   :  { %v323_v30 = vmax.f32 %v1713_v28, 0.0 }
 0x265   :  { %v324_v31 = vpack.c.bf16 %v323_v30, %v322_v29 }
 0x267   :  { %535 = vmatmul.mubr.bf16.vlgmr.msra.gmra.mrb[4].mxu0 %v324_v31  ;;  %1256 = vmatmul.mubr.bf16.vlgmr.msra.gmra.mrb[4].mxu1 %v324_v31 }
 0x268   :  { %1319 = vmatprep.mubr.msk.bf16.mxu1 %vm1538_vm2, %v1537_v1 }
 0x33a   :  { %v536_v38 = vpop.f32.mrb[4].mxu0  ;;  %v579_v39 = vpop.f32.mrb[4].mxu1 }
 0x33b   :  { %v1731_v40 = vadd.f32 %v536_v38, %v362_v34  ;;  %v538_v41 = vpop.f32.mrb[5].mxu0  ;;  %v1257_v42 = vpop.f32.mrb[5].mxu1  ;;  %v1733_v46 = vadd.f32 %v579_v39, %v370_v37 }
 0x33c   :  { %v539_v43 = vadd.f32 %v538_v41, %v366_v36  ;;  %v540_v44 = vpop.f32.mrb[6].mxu0  ;;  %v582_v45 = vpop.f32.mrb[6].mxu1 }
 0x33d   :  { %v541_v47 = vadd.f32 %v540_v44, %v362_v34  ;;  %v1735_v48 = vadd.f32 %v582_v45, %v370_v37  ;;  %v542_v49 = vpop.f32.mrb[7].mxu0  ;;  %v1258_v20 = vpop.f32.mrb[7].mxu1  ;;  %v586_v19 = vmul.f32 %v1731_v40, %v1731_v40 }
 0x33e   :  { %v543_v50 = vadd.f32 %v542_v49, %v366_v36  ;;  %v605_v52 = vmul.f32 %v539_v43, %v539_v43 }
 0x33f   :  { %v587_v22 = vmul.f32 %v541_v47, %v541_v47  ;;  %v625_v51 = vpack.c.bf16 %v1735_v48, %v1733_v46  ;;  %v774_v7 = vmul.f32 16.0, %v1735_v48  ;;  %v838_v48 = vmul.f32 0.5, %v323_v30 }
 0x340   :  { %v606_v53 = vmul.f32 %v543_v50, %v543_v50 }
 0x341   :  { %1259 = vmatprep.subr.bf16.mxu0 %v625_v51  ;;  %v588_v54 = vadd.f32 %v587_v22, %v586_v19 }
 0x342   :  { %1260 = vmatpush3.bf16.msra.mxu0 %v625_v51  ;;  %v607_v55 = vadd.f32 %v606_v53, %v605_v52 }
 0x343   :  { %589 = vadd.xlane.f32.xlu0 %v588_v54  ;;  %1277 = vmatprep.subr.bf16.mxu0 %v1537_v1 }
 0x344   :  { %608 = vadd.xlane.f32.xlu1 %v607_v55 }
 0x3d0   :  { %v590_v56 = vpop.xlane.xlu0 %589 }
 0x3d1   :  { %v591_v57 = vrot.slane %v590_v56, 4  ;;  %v609_v63 = vpop.xlane.xlu1 %608 }
 0x3d2   :  { %v610_v0 = vrot.slane %v609_v63, 4 }
 0x3d3   :  { %v592_v58 = vadd.f32 %v591_v57, %v590_v56 }
 0x3d4   :  { %v611_v2 = vadd.f32 %v610_v0, %v609_v63 }
 0x3d5   :  { %v593_v59 = vrot.slane %v592_v58, 2 }
 0x3d6   :  { %v612_v3 = vrot.slane %v611_v2, 2 }
 0x3d7   :  { %v594_v60 = vadd.f32 %v593_v59, %v592_v58 }
 0x3d8   :  { %v613_v6 = vadd.f32 %v612_v3, %v611_v2 }
 0x3d9   :  { %v595_v61 = vrot.slane %v594_v60, 1 }
 0x3da   :  { %v614_v9 = vrot.slane %v613_v6, 1 }
 0x3db   :  { %v596_v62 = vadd.f32 %v595_v61, %v594_v60 }
 0x3dc   :  { %v615_v11 = vadd.f32 %v614_v9, %v613_v6 }
 0x3dd   :  { %1323 = vpush %v596_v62 }
 0x40e   :  { %s1324_s5 = spop %1323 }
 0x40f   :  { %s598_s12 = sadd.f32 1e-12, %s1324_s5 }
 0x411   :  { %v599_v4 = vstv %s598_s12 }
 0x412   :  { %1398 = vrsqrt.f32 %v599_v4 }
 0x41c   :  { %v1399_v10 = vpop.eup %1398 }
 0x41d   :  { %1325 = vpush %v1399_v10  ;;  %v1385_v10 = vld [vmem:[%s1817_s1] sm:$0xff]  }
 0x41e   :  { %1327 = vpush %v615_v11 }
 0x44e   :  { %s1326_s13 = spop %1325 }
 0x44f   :  { %s1328_s15 = spop %1327  ;;  %v602_v26 = vstv %s1326_s13 }
 0x450   :  { %s617_s16 = sadd.f32 1e-12, %s1328_s15  ;;  %v1743_v32 = vmul.f32 %v602_v26, %v1731_v40  ;;  %v1746_v36 = vmul.f32 %v602_v26, %v541_v47 }
 0x452   :  { %v618_v12 = vstv %s617_s16  ;;  %v764_v9 = vpack.c.bf16 %v1746_v36, %v1743_v32 }
 0x453   :  { %1400 = vrsqrt.f32 %v618_v12 }
 0x45d   :  { %v1401_v13 = vpop.eup %1400 }
 0x45e   :  { %1329 = vpush %v1401_v13 }
 0x48f   :  { %s1330_s17 = spop %1329 }
 0x490   :  { %v621_v14 = vstv %s1330_s17 }
 0x491   :  { %v622_v15 = vmul.f32 %v621_v14, %v539_v43  ;;  %v623_v16 = vmul.f32 %v621_v14, %v543_v50 }
 0x493   :  { %v816_v17 = vadd.f32 %v623_v16, %v622_v15  ;;  %v624_v18 = vpack.c.bf16 %v623_v16, %v622_v15  ;;  %v773_v15 = vmul.f32 16.0, %v1733_v46  ;;  %v1162_v46 = vld [vmem:[%s1825_s9 + $0x4] ss:$0 sm:$0xff] }
 0x495   :  { %v817_v21 = vrot.slane %v816_v17, 4  ;;  %626 = vxpose.xlu0.c.b16.start.end [1/1] (short) %v624_v18, 128 }
 0x497   :  { %v818_v23 = vadd.f32 %v817_v21, %v816_v17 }
 0x499   :  { %v819_v24 = vrot.slane %v818_v23, 2 }
 0x49b   :  { %v820_v25 = vadd.f32 %v819_v24, %v818_v23 }
 0x49d   :  { %v821_v31 = vrot.slane %v820_v25, 1 }
 0x49f   :  { %v822_v33 = vadd.f32 %v821_v31, %v820_v25 }
 0x4a1   :  { %v823_v34 = vmul.f32 %v822_v33, %v1743_v32  ;;  %v824_v37 = vmul.f32 %v822_v33, %v1746_v36  ;;  %v837_v32 = vmul.f32 0.5, %v322_v29 }
 0x4a3   :  { %825 = vadd.xlane.f32.xlu1 %v823_v34 }
 0x4a7   :  { %827 = vadd.xlane.f32.xlu1 %v824_v37 }
 0x4fb   :  { %v634_v38 = vpop.trf.xlu0 }
 0x4fc   :  { %1261 = vmatprep.mubr.msk.bf16.mxu0 %vm642_vm3, %v634_v38 }
 0x4ff   :  { %v635_v39 = vpop.trf.xlu0 }
 0x500   :  { %1262 = vmatmul.mubr.msk.bf16.vlgmr.msra.gmra.mrb[8].mxu0 %vm642_vm3, %v635_v39 }
 0x503   :  { %v636_v41 = vpop.trf.xlu0 }
 0x504   :  { %1265 = vmatprep.mubr.msk.bf16.mxu0 %vm642_vm3, %v636_v41 }
 0x507   :  { %v637_v40 = vpop.trf.xlu0 }
 0x508   :  { %1266 = vmatmul.mubr.msk.bf16.gmra.mrb[12].mxu0 %vm642_vm3, %v637_v40  ;;  %v955_v40 = vunpack.c.l.bf16 %v1676_v35 }
 0x50b   :  { %v638_v42 = vpop.trf.xlu0 }
 0x50c   :  { %1269 = vmatprep.mubr.msk.bf16.mxu0 %vm642_vm3, %v638_v42 }
 0x50f   :  { %v639_v43 = vpop.trf.xlu0 }
 0x510   :  { %1270 = vmatmul.mubr.msk.bf16.gmra.mrb[16].mxu0 %vm642_vm3, %v639_v43 }
 0x513   :  { %v640_v44 = vpop.trf.xlu0 }
 0x514   :  { %1273 = vmatprep.mubr.msk.bf16.mxu0 %vm642_vm3, %v640_v44  ;;  %v956_v44 = vunpack.c.h.bf16 %v1676_v35  ;;  %v1388_v35 = vld [vmem:[#allocation12 + $0x10] sm:$0xff]  }
 0x517   :  { %v641_v45 = vpop.trf.xlu0 }
 0x518   :  { %1274 = vmatmul.mubr.msk.bf16.gmra.mrb[20].mxu0 %vm642_vm3, %v641_v45 }
 0x519   :  { %1293 = vmatprep.mubr.msk.bf16.mxu0 %vm1538_vm2, %v1537_v1 }
 0x530   :  { %v826_v11 = vpop.xlane.xlu1 %825 }
 0x531   :  { %v829_v13 = vadd.f32 16.0, %v826_v11 }
 0x533   :  { %1402 = vrcp.f32 %v829_v13 }
 0x534   :  { %v828_v12 = vpop.xlane.xlu1 %827 }
 0x535   :  { %v830_v14 = vadd.f32 16.0, %v828_v12 }
 0x537   :  { %1404 = vrcp.f32 %v830_v14 }
 0x5d3   :  { %v1263_v47 = vpop.f32.mrb[8].mxu0 }
 0x5d4   :  { %v701_v49 = vpop.f32.mrb[9].mxu0 }
 0x5d5   :  { %v1264_v20 = vpop.f32.mrb[10].mxu0 }
 0x5d6   :  { %v766_v50 = vpack.c.bf16 %v1264_v20, %v1263_v47  ;;  %v704_v19 = vpop.f32.mrb[11].mxu0 }
 0x5d7   :  { %v765_v22 = vpack.c.bf16 %v704_v19, %v701_v49 }
 0x5d9   :  { %1278 = vmatpush3.bf16.msra.mxu0 %v765_v22 }
 0x5da   :  { %1279 = vmatprep.subr.bf16.mxu0 %v1537_v1 }
 0x5db   :  { %v1267_v51 = vpop.f32.mrb[12].mxu0 }
 0x5dc   :  { %v717_v52 = vpop.f32.mrb[13].mxu0 }
 0x5dd   :  { %v1268_v53 = vpop.f32.mrb[14].mxu0  ;;  %1280 = vmatpush3.bf16.msra.mxu0 %v766_v50 }
 0x5de   :  { %v768_v54 = vpack.c.bf16 %v1268_v53, %v1267_v51  ;;  %v720_v55 = vpop.f32.mrb[15].mxu0  ;;  %1281 = vmatprep.subr.bf16.mxu0 %v1537_v1  ;;  %v1387_v53 = vld [vmem:[#allocation12 + $0x8] sm:$0xff]  }
 0x5df   :  { %v767_v56 = vpack.c.bf16 %v720_v55, %v717_v52  ;;  %v1386_v52 = vld [vmem:[#allocation12] sm:$0xff]  }
 0x5e0   :  { %1304 = vmatpush3.bf16.msra.mxu1 %v1386_v52  ;;  %v1390_v55 = vld [vmem:[#allocation12 + $0x20] sm:$0xff]  }
 0x5e1   :  { %1282 = vmatpush3.bf16.msra.mxu0 %v767_v56  ;;  %1305 = vmatprep.subr.bf16.mxu1 %v1537_v1  ;;  %v1391_v56 = vld [vmem:[#allocation12 + $0x28] sm:$0xff]  }
 0x5e2   :  { %1283 = vmatprep.subr.bf16.mxu0 %v1537_v1 }
 0x5e3   :  { %v1271_v57 = vpop.f32.mrb[16].mxu0 }
 0x5e4   :  { %v733_v58 = vpop.f32.mrb[17].mxu0  ;;  %1306 = vmatpush3.bf16.msra.mxu1 %v1387_v53 }
 0x5e5   :  { %v1272_v59 = vpop.f32.mrb[18].mxu0  ;;  %1284 = vmatpush3.bf16.msra.mxu0 %v768_v54  ;;  %1307 = vmatprep.subr.bf16.mxu1 %v1537_v1  ;;  %v1389_v54 = vld [vmem:[#allocation12 + $0x18] sm:$0xff]  }
 0x5e6   :  { %v770_v60 = vpack.c.bf16 %v1272_v59, %v1271_v57  ;;  %v736_v61 = vpop.f32.mrb[19].mxu0  ;;  %1285 = vmatprep.subr.bf16.mxu0 %v1537_v1  ;;  %v1392_v57 = vld [vmem:[#allocation12 + $0x30] sm:$0xff]  }
 0x5e7   :  { %v769_v62 = vpack.c.bf16 %v736_v61, %v733_v58  ;;  %v1393_v58 = vld [vmem:[#allocation12 + $0x38] sm:$0xff]  }
 0x5e8   :  { %1308 = vmatpush3.bf16.msra.mxu1 %v1388_v35 }
 0x5e9   :  { %1286 = vmatpush3.bf16.msra.mxu0 %v769_v62  ;;  %1309 = vmatprep.subr.bf16.mxu1 %v1537_v1 }
 0x5ea   :  { %1287 = vmatprep.subr.bf16.mxu0 %v1537_v1 }
 0x5eb   :  { %v1275_v63 = vpop.f32.mrb[20].mxu0 }
 0x5ec   :  { %v749_v0 = vpop.f32.mrb[21].mxu0  ;;  %1310 = vmatpush3.bf16.msra.mxu1 %v1389_v54 }
 0x5ed   :  { %v1276_v2 = vpop.f32.mrb[22].mxu0  ;;  %1288 = vmatpush3.bf16.msra.mxu0 %v770_v60  ;;  %1311 = vmatprep.subr.bf16.mxu1 %v1537_v1 }
 0x5ee   :  { %v772_v3 = vpack.c.bf16 %v1276_v2, %v1275_v63  ;;  %v752_v4 = vpop.f32.mrb[23].mxu0  ;;  %1289 = vmatprep.subr.bf16.mxu0 %v1537_v1 }
 0x5ef   :  { %v771_v6 = vpack.c.bf16 %v752_v4, %v749_v0 }
 0x5f0   :  { %1312 = vmatpush3.bf16.msra.mxu1 %v1390_v55 }
 0x5f1   :  { %1290 = vmatpush3.bf16.msra.mxu0 %v771_v6  ;;  %1313 = vmatprep.subr.bf16.mxu1 %v1537_v1 }
 0x5f2   :  { %1291 = vmatprep.subr.bf16.mxu0 %v1537_v1 }
 0x5f4   :  { %1314 = vmatpush3.bf16.msra.mxu1 %v1391_v56 }
 0x5f5   :  { %1292 = vmatpush3.bf16.msra.mxu0 %v772_v3  ;;  %1315 = vmatprep.subr.bf16.mxu1 %v1537_v1  ;;  %v1159_v3 = vld [vmem:[%s1825_s9 + $0x2] ss:$0 sm:$0xff] }
 0x5f6   :  { %1297 = vmatprep.subr.bf16.mxu0 %v1537_v1 }
 0x5f8   :  { %1294 = vmatmul.mubr.bf16.vlgmr.msra.gmra.mrb[24].mxu0 %v764_v9  ;;  %1316 = vmatpush3.bf16.msra.mxu1 %v1392_v57 }
 0x5f9   :  { %1298 = vmatpush3.bf16.msra.mxu0 %v276_v8  ;;  %1299 = vmatprep.mubr.msk.bf16.mxu0 %vm1538_vm2, %v1537_v1  ;;  %v1403_v8 = vpop.eup %1402 }
 0x5fa   :  { %v1405_v25 = vpop.eup %1404  ;;  %1317 = vmatprep.subr.bf16.mxu1 %v1537_v1  ;;  %v1160_v1 = vld [vmem:[%s1825_s9 + $0x3] ss:$0 sm:$0xff]  ;;  %s1539_s9 = smov [#allocation14]  }
 0x5fb   :  { %s1099_s23 = sshll.u32 %s1539_s9, 4  ;;  %s1100_s23 = int_to_ptr.vmem [resolvable:$true] %s1099_s23 }
 0x5fc   :  { %1318 = vmatpush3.bf16.msra.mxu1 %v1393_v58  ;;  %s1498_s24 = scalar_lea.vmem %s1100_s23, 256  ;;  %p1503_p5 = scmp.lt.s32.totalorder %s1100_s23, %s1100_s23 }
 0x5fd   :  { %p1499_p4 = scmp.ne.s32.totalorder %s1100_s23, %s1498_s24  ;;  %p1504_p6 = scmp.lt.s32.totalorder %s1498_s24, %s1498_s24 }
 0x5ff   :  { %p1505_p7 = por %p1504_p6, %p1503_p5 }
 0x600   :  { %1300 = vmatmul.mubr.bf16.vlgmr.msra.gmra.mrb[28].mxu0 %v1385_v10 }
 0x601   :  { %p1506_p8 = pnand %p1505_p7, %p1499_p4 }
 0x6cb   :  { %v809_v16 = vpop.f32.mrb[24].mxu0 }
 0x6cc   :  { %v810_v17 = vadd.f32 %v809_v16, %v773_v15  ;;  %v1295_v5 = vpop.f32.mrb[25].mxu0 }
 0x6cd   :  { %v812_v18 = vpop.f32.mrb[26].mxu0 }
 0x6ce   :  { %v832_v21 = vmul.f32 %v1403_v8, %v810_v17  ;;  %v813_v23 = vadd.f32 %v812_v18, %v774_v7  ;;  %v1296_v24 = vpop.f32.mrb[27].mxu0 }
 0x6d0   :  { %v835_v26 = vmul.f32 0.5, %v832_v21  ;;  %v834_v31 = vmul.f32 %v1405_v25, %v813_v23 }
 0x6d2   :  { %v836_v33 = vmul.f32 0.5, %v834_v31  ;;  %v839_v34 = vadd.f32 %v837_v32, %v835_v26  ;;  %v1163_v26 = vld [vmem:[%s1824_s8] ss:$0 sm:$0xff] }
 0x6d3   :  { %v940_v36 = vpop.f32.mrb[28].mxu0 }
 0x6d4   :  { %v964_v37 = vadd.f32 %v1162_v46, %v940_v36  ;;  %843 = vadd.xlane.f32.xlu1 %v839_v34  ;;  %v1301_v38 = vpop.f32.mrb[29].mxu0  ;;  %v840_v39 = vadd.f32 %v838_v48, %v836_v33 }
 0x6d5   :  { %v943_v41 = vpop.f32.mrb[30].mxu0 }
 0x6d6   :  { %v966_v42 = vmax.f32 %v964_v37, 0.0  ;;  %v965_v27 = vadd.f32 %v1162_v46, %v943_v41  ;;  %v1302_v29 = vpop.f32.mrb[31].mxu0 }
 0x6d8   :  { %v968_v43 = vadd.f32 %v966_v42, %v955_v40  ;;  %v967_v45 = vmax.f32 %v965_v27, 0.0  ;;  %845 = vadd.xlane.f32.xlu1 %v840_v39 }
 0x6da   :  { %v969_v47 = vadd.f32 %v967_v45, %v956_v44  ;;  %v970_v7 = vmul.f32 0.8, %v968_v43 }
 0x6dc   :  { %v971_v8 = vmul.f32 0.8, %v969_v47 }
 0x761   :  { %v844_v49 = vpop.xlane.xlu1 %843 }
 0x762   :  { %v847_v28 = vmul.f32 0.0078125, %v844_v49 }
 0x764   :  { %v849_v30 = vsub.f32 %v839_v34, %v847_v28 }
 0x765   :  { %v846_v20 = vpop.xlane.xlu1 %845 }
 0x766   :  { %v848_v50 = vmul.f32 0.0078125, %v846_v20  ;;  %v851_v19 = vmul.f32 %v849_v30, %v849_v30 }
 0x768   :  { %v850_v22 = vsub.f32 %v840_v39, %v848_v50  ;;  %853 = vadd.xlane.f32.xlu1 %v851_v19 }
 0x76a   :  { %v852_v51 = vmul.f32 %v850_v22, %v850_v22 }
 0x76c   :  { %855 = vadd.xlane.f32.xlu1 %v852_v51 }
 0x7f5   :  { %v854_v59 = vpop.xlane.xlu1 %853 }
 0x7f6   :  { %v857_v60 = vmul.f32 0.0078125, %v854_v59 }
 0x7f8   :  { %v859_v61 = vadd.f32 1e-05, %v857_v60 }
 0x7f9   :  { %v856_v62 = vpop.xlane.xlu1 %855 }
 0x7fa   :  { %1406 = vrsqrt.f32 %v859_v61  ;;  %v858_v63 = vmul.f32 0.0078125, %v856_v62 }
 0x7fc   :  { %v860_v0 = vadd.f32 1e-05, %v858_v63 }
 0x7fe   :  { %1408 = vrsqrt.f32 %v860_v0 }
 0x804   :  { %v1407_v2 = vpop.eup %1406 }
 0x805   :  { %v863_v4 = vmul.f32 %v1407_v2, %v849_v30 }
 0x807   :  { %v869_v6 = vmul.f32 %v1159_v3, %v863_v4 }
 0x808   :  { %v1409_v9 = vpop.eup %1408 }
 0x809   :  { %v864_v10 = vmul.f32 %v1409_v9, %v850_v22  ;;  %v875_v12 = vadd.f32 %v1160_v1, %v869_v6 }
 0x80b   :  { %v870_v11 = vmul.f32 %v1159_v3, %v864_v10  ;;  %v877_v14 = vmax.f32 %v875_v12, 0.0 }
 0x80d   :  { %v876_v13 = vadd.f32 %v1160_v1, %v870_v11 }
 0x80f   :  { %v878_v15 = vmax.f32 %v876_v13, 0.0 }
 0x811   :  { %v879_v16 = vpack.c.bf16 %v878_v15, %v877_v14 }
 0x813   :  { %v973_v17 = vunpack.c.l.bf16 %v879_v16  ;;  %v974_v5 = vunpack.c.h.bf16 %v879_v16 }
 0x815   :  { %v975_v18 = vmul.f32 0.2, %v973_v17  ;;  %v976_v21 = vmul.f32 0.2, %v974_v5 }
 0x817   :  { %v977_v23 = vadd.f32 %v975_v18, %v970_v7  ;;  %v978_v24 = vadd.f32 %v976_v21, %v971_v8 }
 0x819   :  { %v979_v25 = vpack.c.bf16 %v978_v24, %v977_v23 }
 0x81b   :  { %1320 = vmatmul.mubr.bf16.vlgmr.msra.gmra.mrb[8].mxu1 %v979_v25 }
 0x8ee   :  { %v1085_v31 = vpop.f32.mrb[8].mxu1 }
 0x8ef   :  { %v1086_v32 = vadd.f32 %v1163_v26, %v1085_v31  ;;  %v1321_v46 = vpop.f32.mrb[9].mxu1 }
 0x8f0   :  { %v1088_v33 = vpop.f32.mrb[10].mxu1 }
 0x8f1   :  { %1092 = vst [vmem:[#allocation14] sm:$0xff] %v1086_v32  ;;  %v1089_v34 = vadd.f32 %v1163_v26, %v1088_v33  ;;  %v1322_v48 = vpop.f32.mrb[11].mxu1 }
 0x8f3   :  { %1093 = vst [vmem:[#allocation14 + $0x8] sm:$0xff] %v1089_v34 }
 0x8f4   :  { %1509 = shalt.err (!%p1506_p8)
}
 0x8f5   :  { %s1510_s25 = scalar_lea.hbm %s1826_s10, 256 }
 0x8f6   :  { %p1511_p9 = scmp.ne.s32.totalorder %s1826_s10, %s1510_s25  ;;  %p1514_p10 = scmp.lt.u32.totalorder %s1510_s25, %s1826_s10 }
 0x8f8   :  { %p1516_p11 = pnand %p1514_p10, %p1511_p9 }
 0x8fa   :  { %1519 = shalt.err (!%p1516_p11)
}
 0x8fb   :  { %s1540_s3 = smov 128   ;;  %s1541_s28 = smov 8  }
 0x8fc   :  { %1105 = dma.vmem_to_hbm [thread:$0]  %s1100_s23, 256, %s1826_s10, [#allocation8], %s1540_s3, %s1540_s3, %s1541_s28  }
 0x8fd   :  { %1526 = dma.done.wait [#allocation8], 256  }
 0x8fe   :  { %1527 = vsyncadd [#allocation8], 4294967040 }
 0x8ff   :  { %1109 = vsyncpa [#allocation7], 1 }
 0x900   :  { %1110 = vsyncpa [#allocation10], 1 }
 0x901   :  { %1111 = vsyncpa [#allocation13], 1 }
 0x902   :  { %1112 = vsyncpa [#allocation8], 1 }

</bundles_post_ra>
